<compile_context>
chip_gen: v5e
topology: v5e:2x2
jax: 0.10.0
libtpu: 0.0.40
codegen_flags: <defaults>
</compile_context>

<pallas_src>
import math

import jax
import jax.numpy as jnp
from jax.experimental import pallas as pl
from jax.experimental.pallas import tpu as pltpu


def _make_boundary_masks(H, W):
    """(9, H*W) f32 0/1 masks: tap k valid iff the tapped pixel is in-image."""
    HW = H * W
    p = jnp.arange(HW, dtype=jnp.int32)
    row = p // W
    col = p % W
    ms = []
    for i in range(3):
        for j in range(3):
            dh, dw = i - 1, j - 1
            ok = ((row + dh >= 0) & (row + dh <= H - 1) &
                  (col + dw >= 0) & (col + dw <= W - 1))
            ms.append(ok.astype(jnp.float32))
    return jnp.stack(ms, axis=0)


def _pack_weights(w_hwio, N, C):
    """HWIO (3,3,Cin,Cout) -> (N*Cout, 9*N*Cin), block-diagonal over batch.

    Wbig[n*C + co, k*N*C + m*C + ci] = w[i, j, ci, co] if m == n else 0,
    matching im2col slab rows  k*N*C + n*C + ci.
    """
    wk = jnp.transpose(w_hwio.reshape(9, C, C), (0, 2, 1))   # (9, Cout, Cin)
    eye = jnp.eye(N, dtype=w_hwio.dtype)                     # (N, N)
    big = jnp.einsum('koc,nm->nokmc', wk, eye)               # (N,Cout,9,N,Cin)
    return big.reshape(N * C, 9 * N * C)


def _make_br_kernel(N, C, H, W):
    """Kernel body for fixed (N, C, H, W); batch folded into sublanes."""
    HW = H * W
    NC = N * C
    CENTER = 4  # (dh, dw) == (0, 0)

    def kernel(x_ref, m_ref, w1_ref, b1_ref, w2_ref, b2_ref, out_ref, slab_ref):
        x = x_ref[...]                                        # (NC, HW) f32

        def build_slab(a):
            # Write the 9 shifted/masked taps into the im2col slab.
            # Rolls run per-row (batch/channel rows never mix); wrap-around
            # and cross-row leakage are exactly the out-of-image taps, which
            # the precomputed masks zero.
            for k in range(9):
                dh, dw = k // 3 - 1, k % 3 - 1
                s = dh * W + dw
                patch = a if s == 0 else pltpu.roll(a, (-s) % HW, axis=1)
                if k != CENTER:
                    patch = patch * m_ref[k:k + 1, :]         # (1,HW) bcast
                slab_ref[k * NC:(k + 1) * NC, :] = patch      # 8-aligned store

        def conv3x3(a, w_ref, b_ref):
            build_slab(a)
            # Single MXU matmul per conv: (NC, 9*NC) @ (9*NC, HW).
            acc = jnp.dot(w_ref[...], slab_ref[...],
                          preferred_element_type=jnp.float32,
                          precision=jax.lax.Precision.HIGHEST)
            return acc + b_ref[...]

        h = jnp.maximum(conv3x3(x, w1_ref, b1_ref), 0.0)      # conv1 + ReLU
        y = conv3x3(h, w2_ref, b2_ref) + x                    # conv2 + residual
        out_ref[...] = y.astype(out_ref.dtype)                # dense (NC,HW) store

    return kernel


def br_module_forward(x, w1, b1, w2, b2):
    """x: (N, C, H, W) f32; w*: (3, 3, C, C) HWIO; b*: (C,)."""
    N, C, H, W = x.shape
    HW = H * W
    NC = N * C

    xf = x.reshape(NC, HW)                       # batch folded into sublanes
    wp1 = _pack_weights(w1, N, C)                # (NC, 9*NC)
    wp2 = _pack_weights(w2, N, C)
    b1t = jnp.tile(b1, N).reshape(NC, 1)
    b2t = jnp.tile(b2, N).reshape(NC, 1)
    masks = _make_boundary_masks(H, W)           # (9, HW) f32 0/1

    # Single invocation (no grid): whole arrays live in VMEM (a few KiB).
    out = pl.pallas_call(
        _make_br_kernel(N, C, H, W),
        out_shape=jax.ShapeDtypeStruct((NC, HW), x.dtype),
        scratch_shapes=[pltpu.VMEM((9 * NC, HW), jnp.float32)],   # im2col slab
    )(xf, masks, wp1, b1t, wp2, b2t)
    return out.reshape(N, C, H, W)


def br_module_reference(x, w1, b1, w2, b2):
    """Pure-JAX reference matching the PyTorch forward."""
    dn = ("NCHW", "HWIO", "NCHW")
    r = jax.lax.conv_general_dilated(x, w1, window_strides=(1, 1),
                                     padding="SAME", dimension_numbers=dn)
    r = jnp.maximum(r + b1[None, :, None, None], 0.0)
    r = jax.lax.conv_general_dilated(r, w2, window_strides=(1, 1),
                                     padding="SAME", dimension_numbers=dn)
    r = r + b2[None, :, None, None]
    return r + x


if __name__ == "__main__":
    N, C, H, W = 2, 4, 16, 16

    key = jax.random.PRNGKey(0)
    kx, kw1, kb1, kw2, kb2 = jax.random.split(key, 5)

    x = jax.random.normal(kx, (N, C, H, W), jnp.float32)

    # Deterministic init mimicking nn.Conv2d's default uniform bound.
    fan_in = C * 3 * 3
    bound = 1.0 / math.sqrt(fan_in)
    w1 = jax.random.uniform(kw1, (3, 3, C, C), jnp.float32, -bound, bound)
    b1 = jax.random.uniform(kb1, (C,), jnp.float32, -bound, bound)
    w2 = jax.random.uniform(kw2, (3, 3, C, C), jnp.float32, -bound, bound)
    b2 = jax.random.uniform(kb2, (C,), jnp.float32, -bound, bound)

    out = br_module_forward(x, w1, b1, w2, b2)
    out = jax.block_until_ready(out)

    ref = br_module_reference(x, w1, b1, w2, b2)
    assert out.shape == (N, C, H, W)
    assert jnp.allclose(out, ref, atol=1e-4, rtol=1e-4), float(jnp.max(jnp.abs(out - ref)))

    print("KERNEL_OK")
</pallas_src>

<mosaic_0001>
module attributes {stable_mosaic.version = 11 : i64} {
  func.func @kernel(%arg0: memref<8x256xf32, #tpu.memory_space<vmem>>, %arg1: memref<9x256xf32, #tpu.memory_space<vmem>>, %arg2: memref<8x72xf32, #tpu.memory_space<vmem>>, %arg3: memref<8x1xf32, #tpu.memory_space<vmem>>, %arg4: memref<8x72xf32, #tpu.memory_space<vmem>>, %arg5: memref<8x1xf32, #tpu.memory_space<vmem>>, %arg6: memref<8x256xf32, #tpu.memory_space<vmem>>, %arg7: memref<72x256xf32, #tpu.memory_space<vmem>>) attributes {dimension_semantics = [], scalar_prefetch = 0 : i64, scratch_operands = 1 : i64, tpu.core_type = #tpu.core_type<tc>} {
    %c0 = arith.constant 0 : index
    %c0_0 = arith.constant 0 : index
    %0 = vector.load %arg0[%c0, %c0_0] : memref<8x256xf32, #tpu.memory_space<vmem>>, vector<8x256xf32>
    %c17_i32 = arith.constant 17 : i32
    %1 = tpu.dynamic_rotate %0 by %c17_i32 dim 1 : vector<8x256xf32>, i32 -> vector<8x256xf32>
    %c0_1 = arith.constant 0 : index
    %c0_2 = arith.constant 0 : index
    %2 = vector.load %arg1[%c0_1, %c0_2] : memref<9x256xf32, #tpu.memory_space<vmem>>, vector<1x256xf32>
    %3 = vector.broadcast %2 : vector<1x256xf32> to vector<8x256xf32>
    %4 = arith.mulf %1, %3 : vector<8x256xf32>
    %c0_3 = arith.constant 0 : index
    %c0_4 = arith.constant 0 : index
    %5 = vector.load %arg7[%c0_3, %c0_4] : memref<72x256xf32, #tpu.memory_space<vmem>>, vector<8x256xf32>
    tpu.vector_store %arg7[%c0_3, %c0_4], %4 {strides = array<i32>} : memref<72x256xf32, #tpu.memory_space<vmem>>, vector<8x256xf32>,
    %c16_i32 = arith.constant 16 : i32
    %6 = tpu.dynamic_rotate %0 by %c16_i32 dim 1 : vector<8x256xf32>, i32 -> vector<8x256xf32>
    %c1 = arith.constant 1 : index
    %c0_5 = arith.constant 0 : index
    %7 = vector.load %arg1[%c1, %c0_5] : memref<9x256xf32, #tpu.memory_space<vmem>>, vector<1x256xf32>
    %8 = vector.broadcast %7 : vector<1x256xf32> to vector<8x256xf32>
    %9 = arith.mulf %6, %8 : vector<8x256xf32>
    %c8 = arith.constant 8 : index
    %c0_6 = arith.constant 0 : index
    %10 = vector.load %arg7[%c8, %c0_6] : memref<72x256xf32, #tpu.memory_space<vmem>>, vector<8x256xf32>
    tpu.vector_store %arg7[%c8, %c0_6], %9 {strides = array<i32>} : memref<72x256xf32, #tpu.memory_space<vmem>>, vector<8x256xf32>,
    %c15_i32 = arith.constant 15 : i32
    %11 = tpu.dynamic_rotate %0 by %c15_i32 dim 1 : vector<8x256xf32>, i32 -> vector<8x256xf32>
    %c2 = arith.constant 2 : index
    %c0_7 = arith.constant 0 : index
    %12 = vector.load %arg1[%c2, %c0_7] : memref<9x256xf32, #tpu.memory_space<vmem>>, vector<1x256xf32>
    %13 = vector.broadcast %12 : vector<1x256xf32> to vector<8x256xf32>
    %14 = arith.mulf %11, %13 : vector<8x256xf32>
    %c16 = arith.constant 16 : index
    %c0_8 = arith.constant 0 : index
    %15 = vector.load %arg7[%c16, %c0_8] : memref<72x256xf32, #tpu.memory_space<vmem>>, vector<8x256xf32>
    tpu.vector_store %arg7[%c16, %c0_8], %14 {strides = array<i32>} : memref<72x256xf32, #tpu.memory_space<vmem>>, vector<8x256xf32>,
    %c1_i32 = arith.constant 1 : i32
    %16 = tpu.dynamic_rotate %0 by %c1_i32 dim 1 : vector<8x256xf32>, i32 -> vector<8x256xf32>
    %c3 = arith.constant 3 : index
    %c0_9 = arith.constant 0 : index
    %17 = vector.load %arg1[%c3, %c0_9] : memref<9x256xf32, #tpu.memory_space<vmem>>, vector<1x256xf32>
    %18 = vector.broadcast %17 : vector<1x256xf32> to vector<8x256xf32>
    %19 = arith.mulf %16, %18 : vector<8x256xf32>
    %c24 = arith.constant 24 : index
    %c0_10 = arith.constant 0 : index
    %20 = vector.load %arg7[%c24, %c0_10] : memref<72x256xf32, #tpu.memory_space<vmem>>, vector<8x256xf32>
    tpu.vector_store %arg7[%c24, %c0_10], %19 {strides = array<i32>} : memref<72x256xf32, #tpu.memory_space<vmem>>, vector<8x256xf32>,
    %c32 = arith.constant 32 : index
    %c0_11 = arith.constant 0 : index
    %21 = vector.load %arg7[%c32, %c0_11] : memref<72x256xf32, #tpu.memory_space<vmem>>, vector<8x256xf32>
    tpu.vector_store %arg7[%c32, %c0_11], %0 {strides = array<i32>} : memref<72x256xf32, #tpu.memory_space<vmem>>, vector<8x256xf32>,
    %c255_i32 = arith.constant 255 : i32
    %22 = tpu.dynamic_rotate %0 by %c255_i32 dim 1 : vector<8x256xf32>, i32 -> vector<8x256xf32>
    %c5 = arith.constant 5 : index
    %c0_12 = arith.constant 0 : index
    %23 = vector.load %arg1[%c5, %c0_12] : memref<9x256xf32, #tpu.memory_space<vmem>>, vector<1x256xf32>
    %24 = vector.broadcast %23 : vector<1x256xf32> to vector<8x256xf32>
    %25 = arith.mulf %22, %24 : vector<8x256xf32>
    %c40 = arith.constant 40 : index
    %c0_13 = arith.constant 0 : index
    %26 = vector.load %arg7[%c40, %c0_13] : memref<72x256xf32, #tpu.memory_space<vmem>>, vector<8x256xf32>
    tpu.vector_store %arg7[%c40, %c0_13], %25 {strides = array<i32>} : memref<72x256xf32, #tpu.memory_space<vmem>>, vector<8x256xf32>,
    %c241_i32 = arith.constant 241 : i32
    %27 = tpu.dynamic_rotate %0 by %c241_i32 dim 1 : vector<8x256xf32>, i32 -> vector<8x256xf32>
    %c6 = arith.constant 6 : index
    %c0_14 = arith.constant 0 : index
    %28 = vector.load %arg1[%c6, %c0_14] : memref<9x256xf32, #tpu.memory_space<vmem>>, vector<1x256xf32>
    %29 = vector.broadcast %28 : vector<1x256xf32> to vector<8x256xf32>
    %30 = arith.mulf %27, %29 : vector<8x256xf32>
    %c48 = arith.constant 48 : index
    %c0_15 = arith.constant 0 : index
    %31 = vector.load %arg7[%c48, %c0_15] : memref<72x256xf32, #tpu.memory_space<vmem>>, vector<8x256xf32>
    tpu.vector_store %arg7[%c48, %c0_15], %30 {strides = array<i32>} : memref<72x256xf32, #tpu.memory_space<vmem>>, vector<8x256xf32>,
    %c240_i32 = arith.constant 240 : i32
    %32 = tpu.dynamic_rotate %0 by %c240_i32 dim 1 : vector<8x256xf32>, i32 -> vector<8x256xf32>
    %c7 = arith.constant 7 : index
    %c0_16 = arith.constant 0 : index
    %33 = vector.load %arg1[%c7, %c0_16] : memref<9x256xf32, #tpu.memory_space<vmem>>, vector<1x256xf32>
    %34 = vector.broadcast %33 : vector<1x256xf32> to vector<8x256xf32>
    %35 = arith.mulf %32, %34 : vector<8x256xf32>
    %c56 = arith.constant 56 : index
    %c0_17 = arith.constant 0 : index
    %36 = vector.load %arg7[%c56, %c0_17] : memref<72x256xf32, #tpu.memory_space<vmem>>, vector<8x256xf32>
    tpu.vector_store %arg7[%c56, %c0_17], %35 {strides = array<i32>} : memref<72x256xf32, #tpu.memory_space<vmem>>, vector<8x256xf32>,
    %c239_i32 = arith.constant 239 : i32
    %37 = tpu.dynamic_rotate %0 by %c239_i32 dim 1 : vector<8x256xf32>, i32 -> vector<8x256xf32>
    %c8_18 = arith.constant 8 : index
    %c0_19 = arith.constant 0 : index
    %38 = vector.load %arg1[%c8_18, %c0_19] : memref<9x256xf32, #tpu.memory_space<vmem>>, vector<1x256xf32>
    %39 = vector.broadcast %38 : vector<1x256xf32> to vector<8x256xf32>
    %40 = arith.mulf %37, %39 : vector<8x256xf32>
    %c64 = arith.constant 64 : index
    %c0_20 = arith.constant 0 : index
    %41 = vector.load %arg7[%c64, %c0_20] : memref<72x256xf32, #tpu.memory_space<vmem>>, vector<8x256xf32>
    tpu.vector_store %arg7[%c64, %c0_20], %40 {strides = array<i32>} : memref<72x256xf32, #tpu.memory_space<vmem>>, vector<8x256xf32>,
    %c0_21 = arith.constant 0 : index
    %c0_22 = arith.constant 0 : index
    %42 = vector.load %arg2[%c0_21, %c0_22] : memref<8x72xf32, #tpu.memory_space<vmem>>, vector<8x72xf32>
    %c0_23 = arith.constant 0 : index
    %c0_24 = arith.constant 0 : index
    %43 = vector.load %arg7[%c0_23, %c0_24] : memref<72x256xf32, #tpu.memory_space<vmem>>, vector<72x256xf32>
    %cst = arith.constant dense<0.000000e+00> : vector<8x256xf32>
    %44 = tpu.matmul %42, %43, %cst {dimension_numbers = #tpu.dot_dimension_numbers<[1], [0], [0], [1], [0, 0, 1, 1], [], []>, precision = #tpu.contract_precision<fp32>} : vector<8x72xf32>, vector<72x256xf32>, vector<8x256xf32> -> vector<8x256xf32>
    %c0_25 = arith.constant 0 : index
    %c0_26 = arith.constant 0 : index
    %45 = vector.load %arg3[%c0_25, %c0_26] : memref<8x1xf32, #tpu.memory_space<vmem>>, vector<8x1xf32>
    %46 = vector.broadcast %45 : vector<8x1xf32> to vector<8x256xf32>
    %47 = arith.addf %44, %46 : vector<8x256xf32>
    %cst_27 = arith.constant 0.000000e+00 : f32
    %48 = vector.broadcast %cst_27 : f32 to vector<8x256xf32>
    %49 = arith.maximumf %47, %48 : vector<8x256xf32>
    %c17_i32_28 = arith.constant 17 : i32
    %50 = tpu.dynamic_rotate %49 by %c17_i32_28 dim 1 : vector<8x256xf32>, i32 -> vector<8x256xf32>
    %c0_29 = arith.constant 0 : index
    %c0_30 = arith.constant 0 : index
    %51 = vector.load %arg1[%c0_29, %c0_30] : memref<9x256xf32, #tpu.memory_space<vmem>>, vector<1x256xf32>
    %52 = vector.broadcast %51 : vector<1x256xf32> to vector<8x256xf32>
    %53 = arith.mulf %50, %52 : vector<8x256xf32>
    %c0_31 = arith.constant 0 : index
    %c0_32 = arith.constant 0 : index
    %54 = vector.load %arg7[%c0_31, %c0_32] : memref<72x256xf32, #tpu.memory_space<vmem>>, vector<8x256xf32>
    tpu.vector_store %arg7[%c0_31, %c0_32], %53 {strides = array<i32>} : memref<72x256xf32, #tpu.memory_space<vmem>>, vector<8x256xf32>,
    %c16_i32_33 = arith.constant 16 : i32
    %55 = tpu.dynamic_rotate %49 by %c16_i32_33 dim 1 : vector<8x256xf32>, i32 -> vector<8x256xf32>
    %c1_34 = arith.constant 1 : index
    %c0_35 = arith.constant 0 : index
    %56 = vector.load %arg1[%c1_34, %c0_35] : memref<9x256xf32, #tpu.memory_space<vmem>>, vector<1x256xf32>
    %57 = vector.broadcast %56 : vector<1x256xf32> to vector<8x256xf32>
    %58 = arith.mulf %55, %57 : vector<8x256xf32>
    %c8_36 = arith.constant 8 : index
    %c0_37 = arith.constant 0 : index
    %59 = vector.load %arg7[%c8_36, %c0_37] : memref<72x256xf32, #tpu.memory_space<vmem>>, vector<8x256xf32>
    tpu.vector_store %arg7[%c8_36, %c0_37], %58 {strides = array<i32>} : memref<72x256xf32, #tpu.memory_space<vmem>>, vector<8x256xf32>,
    %c15_i32_38 = arith.constant 15 : i32
    %60 = tpu.dynamic_rotate %49 by %c15_i32_38 dim 1 : vector<8x256xf32>, i32 -> vector<8x256xf32>
    %c2_39 = arith.constant 2 : index
    %c0_40 = arith.constant 0 : index
    %61 = vector.load %arg1[%c2_39, %c0_40] : memref<9x256xf32, #tpu.memory_space<vmem>>, vector<1x256xf32>
    %62 = vector.broadcast %61 : vector<1x256xf32> to vector<8x256xf32>
    %63 = arith.mulf %60, %62 : vector<8x256xf32>
    %c16_41 = arith.constant 16 : index
    %c0_42 = arith.constant 0 : index
    %64 = vector.load %arg7[%c16_41, %c0_42] : memref<72x256xf32, #tpu.memory_space<vmem>>, vector<8x256xf32>
    tpu.vector_store %arg7[%c16_41, %c0_42], %63 {strides = array<i32>} : memref<72x256xf32, #tpu.memory_space<vmem>>, vector<8x256xf32>,
    %c1_i32_43 = arith.constant 1 : i32
    %65 = tpu.dynamic_rotate %49 by %c1_i32_43 dim 1 : vector<8x256xf32>, i32 -> vector<8x256xf32>
    %c3_44 = arith.constant 3 : index
    %c0_45 = arith.constant 0 : index
    %66 = vector.load %arg1[%c3_44, %c0_45] : memref<9x256xf32, #tpu.memory_space<vmem>>, vector<1x256xf32>
    %67 = vector.broadcast %66 : vector<1x256xf32> to vector<8x256xf32>
    %68 = arith.mulf %65, %67 : vector<8x256xf32>
    %c24_46 = arith.constant 24 : index
    %c0_47 = arith.constant 0 : index
    %69 = vector.load %arg7[%c24_46, %c0_47] : memref<72x256xf32, #tpu.memory_space<vmem>>, vector<8x256xf32>
    tpu.vector_store %arg7[%c24_46, %c0_47], %68 {strides = array<i32>} : memref<72x256xf32, #tpu.memory_space<vmem>>, vector<8x256xf32>,
    %c32_48 = arith.constant 32 : index
    %c0_49 = arith.constant 0 : index
    %70 = vector.load %arg7[%c32_48, %c0_49] : memref<72x256xf32, #tpu.memory_space<vmem>>, vector<8x256xf32>
    tpu.vector_store %arg7[%c32_48, %c0_49], %49 {strides = array<i32>} : memref<72x256xf32, #tpu.memory_space<vmem>>, vector<8x256xf32>,
    %c255_i32_50 = arith.constant 255 : i32
    %71 = tpu.dynamic_rotate %49 by %c255_i32_50 dim 1 : vector<8x256xf32>, i32 -> vector<8x256xf32>
    %c5_51 = arith.constant 5 : index
    %c0_52 = arith.constant 0 : index
    %72 = vector.load %arg1[%c5_51, %c0_52] : memref<9x256xf32, #tpu.memory_space<vmem>>, vector<1x256xf32>
    %73 = vector.broadcast %72 : vector<1x256xf32> to vector<8x256xf32>
    %74 = arith.mulf %71, %73 : vector<8x256xf32>
    %c40_53 = arith.constant 40 : index
    %c0_54 = arith.constant 0 : index
    %75 = vector.load %arg7[%c40_53, %c0_54] : memref<72x256xf32, #tpu.memory_space<vmem>>, vector<8x256xf32>
    tpu.vector_store %arg7[%c40_53, %c0_54], %74 {strides = array<i32>} : memref<72x256xf32, #tpu.memory_space<vmem>>, vector<8x256xf32>,
    %c241_i32_55 = arith.constant 241 : i32
    %76 = tpu.dynamic_rotate %49 by %c241_i32_55 dim 1 : vector<8x256xf32>, i32 -> vector<8x256xf32>
    %c6_56 = arith.constant 6 : index
    %c0_57 = arith.constant 0 : index
    %77 = vector.load %arg1[%c6_56, %c0_57] : memref<9x256xf32, #tpu.memory_space<vmem>>, vector<1x256xf32>
    %78 = vector.broadcast %77 : vector<1x256xf32> to vector<8x256xf32>
    %79 = arith.mulf %76, %78 : vector<8x256xf32>
    %c48_58 = arith.constant 48 : index
    %c0_59 = arith.constant 0 : index
    %80 = vector.load %arg7[%c48_58, %c0_59] : memref<72x256xf32, #tpu.memory_space<vmem>>, vector<8x256xf32>
    tpu.vector_store %arg7[%c48_58, %c0_59], %79 {strides = array<i32>} : memref<72x256xf32, #tpu.memory_space<vmem>>, vector<8x256xf32>,
    %c240_i32_60 = arith.constant 240 : i32
    %81 = tpu.dynamic_rotate %49 by %c240_i32_60 dim 1 : vector<8x256xf32>, i32 -> vector<8x256xf32>
    %c7_61 = arith.constant 7 : index
    %c0_62 = arith.constant 0 : index
    %82 = vector.load %arg1[%c7_61, %c0_62] : memref<9x256xf32, #tpu.memory_space<vmem>>, vector<1x256xf32>
    %83 = vector.broadcast %82 : vector<1x256xf32> to vector<8x256xf32>
    %84 = arith.mulf %81, %83 : vector<8x256xf32>
    %c56_63 = arith.constant 56 : index
    %c0_64 = arith.constant 0 : index
    %85 = vector.load %arg7[%c56_63, %c0_64] : memref<72x256xf32, #tpu.memory_space<vmem>>, vector<8x256xf32>
    tpu.vector_store %arg7[%c56_63, %c0_64], %84 {strides = array<i32>} : memref<72x256xf32, #tpu.memory_space<vmem>>, vector<8x256xf32>,
    %c239_i32_65 = arith.constant 239 : i32
    %86 = tpu.dynamic_rotate %49 by %c239_i32_65 dim 1 : vector<8x256xf32>, i32 -> vector<8x256xf32>
    %c8_66 = arith.constant 8 : index
    %c0_67 = arith.constant 0 : index
    %87 = vector.load %arg1[%c8_66, %c0_67] : memref<9x256xf32, #tpu.memory_space<vmem>>, vector<1x256xf32>
    %88 = vector.broadcast %87 : vector<1x256xf32> to vector<8x256xf32>
    %89 = arith.mulf %86, %88 : vector<8x256xf32>
    %c64_68 = arith.constant 64 : index
    %c0_69 = arith.constant 0 : index
    %90 = vector.load %arg7[%c64_68, %c0_69] : memref<72x256xf32, #tpu.memory_space<vmem>>, vector<8x256xf32>
    tpu.vector_store %arg7[%c64_68, %c0_69], %89 {strides = array<i32>} : memref<72x256xf32, #tpu.memory_space<vmem>>, vector<8x256xf32>,
    %c0_70 = arith.constant 0 : index
    %c0_71 = arith.constant 0 : index
    %91 = vector.load %arg4[%c0_70, %c0_71] : memref<8x72xf32, #tpu.memory_space<vmem>>, vector<8x72xf32>
    %c0_72 = arith.constant 0 : index
    %c0_73 = arith.constant 0 : index
    %92 = vector.load %arg7[%c0_72, %c0_73] : memref<72x256xf32, #tpu.memory_space<vmem>>, vector<72x256xf32>
    %cst_74 = arith.constant dense<0.000000e+00> : vector<8x256xf32>
    %93 = tpu.matmul %91, %92, %cst_74 {dimension_numbers = #tpu.dot_dimension_numbers<[1], [0], [0], [1], [0, 0, 1, 1], [], []>, precision = #tpu.contract_precision<fp32>} : vector<8x72xf32>, vector<72x256xf32>, vector<8x256xf32> -> vector<8x256xf32>
    %c0_75 = arith.constant 0 : index
    %c0_76 = arith.constant 0 : index
    %94 = vector.load %arg5[%c0_75, %c0_76] : memref<8x1xf32, #tpu.memory_space<vmem>>, vector<8x1xf32>
    %95 = vector.broadcast %94 : vector<8x1xf32> to vector<8x256xf32>
    %96 = arith.addf %93, %95 : vector<8x256xf32>
    %97 = arith.addf %96, %0 : vector<8x256xf32>
    %c0_77 = arith.constant 0 : index
    %c0_78 = arith.constant 0 : index
    %98 = vector.load %arg6[%c0_77, %c0_78] : memref<8x256xf32, #tpu.memory_space<vmem>>, vector<8x256xf32>
    tpu.vector_store %arg6[%c0_77, %c0_78], %97 {strides = array<i32>} : memref<8x256xf32, #tpu.memory_space<vmem>>, vector<8x256xf32>,
    return
  }
}

</mosaic_0001>

<bundles_post_ra>
// kernel: tpu_custom_call.1
= control target key start
LH: loop header
LB: loop body
LE: loop exit
PB: predicated region body
PF: predicated region fallthrough
CT: control target
= control target key end

     0   :  { %11 = vsyncpa [#allocation4], 0  ;;  %s2437_s0 = inlined_call_operand.vmem [shape: f32[8,256], index: 0, kind: input, shape index: {}]   ;;  %s2438_s1 = inlined_call_operand.hbm [shape: f32[9,256], index: 1, kind: input, shape index: {}]   ;;  %s2439_s2 = inlined_call_operand.hbm [shape: f32[8,72], index: 2, kind: input, shape index: {}]   ;;  %s2440_s3 = inlined_call_operand.vmem [shape: f32[8,1], index: 3, kind: input, shape index: {}]   ;;  %s2441_s4 = inlined_call_operand.hbm [shape: f32[8,72], index: 4, kind: input, shape index: {}]   ;;  %s2442_s5 = inlined_call_operand.vmem [shape: f32[8,1], index: 5, kind: input, shape index: {}]   ;;  %s2443_s6 = inlined_call_operand.hbm [shape: f32[8,256], index: 6, kind: output, shape index: {}]  }
   0x1   :  { %12 = vsyncpa [#allocation7], 0  ;;  %s34_s23 = sshll.u32 %s2439_s2, 4  ;;  %s35_s23 = int_to_ptr.hbm [resolvable:$true] %s34_s23 }
   0x2   :  { %13 = vsyncpa [#allocation5], 0  ;;  %s1547_s24 = smov [#allocation6]   ;;  %s20_s28 = sshll.u32 %s2438_s1, 4  ;;  %s21_s28 = int_to_ptr.hbm [resolvable:$true] %s20_s28 }
   0x3   :  { %s36_s25 = sshll.u32 %s1547_s24, 4  ;;  %s1548_s29 = smov [#allocation3]   ;;  %s37_s25 = int_to_ptr.vmem [resolvable:$true] %s36_s25 }
   0x4   :  { %39 = dma.hbm_to_vmem [thread:$0]  %s35_s23, 128, %s37_s25, [#allocation7]  }
   0x5   :  { %s22_s30 = sshll.u32 %s1548_s29, 4  ;;  %s1549_s7 = smov 256   ;;  %s23_s30 = int_to_ptr.vmem [resolvable:$true] %s22_s30 }
   0x6   :  { %s1550_s8 = smov 16   ;;  %s47_s10 = sshll.u32 %s2441_s4, 4  ;;  %s48_s10 = int_to_ptr.hbm [resolvable:$true] %s47_s10 }
   0x7   :  { %28 = dma.hbm_to_vmem [thread:$0]  %s21_s28, 512, %s23_s30, [#allocation4], %s1549_s7, %s1549_s7, %s1550_s8  }
   0x8   :  { %s1551_s11 = smov [#allocation8]  }
   0x9   :  { %s49_s12 = sshll.u32 %s1551_s11, 4  ;;  %s50_s12 = int_to_ptr.vmem [resolvable:$true] %s49_s12 }
   0xa   :  { %52 = dma.hbm_to_vmem [thread:$0]  %s48_s10, 128, %s50_s12, [#allocation7]  }
   0xb   :  { %1541 = dma.done.wait [#allocation4], 512  }
   0xc   :  { %1542 = vsyncadd [#allocation4], 4294966784 }
   0xd   :  { %1543 = dma.done.wait [#allocation7], 256  }
   0xe   :  { %1544 = vsyncadd [#allocation7], 4294967040  ;;  %v1609_v0 = vld [vmem:[%s2437_s0] sm:$0xff]  ;;  %s1552_s14 = smov 112   ;;  %s1553_s15 = smov 111   ;;  %v1620_v1 = vld [vmem:[%s2437_s0 + $0x8] sm:$0xff]  ;;  %v73_v3 = vlaneseq }
   0xf   :  { %180 = vrot.lane.b32.xlu1 %v1609_v0, %s1552_s14  ;;  %198 = vrot.lane.b32.xlu0 %v1609_v0, %s1553_s15  ;;  %s1554_s4 = smov 113   ;;  %s1555_s18 = smov 127   ;;  %v1650_v5 = vld [vmem:[#allocation3 + $0x6] ss:$8 sm:$0x3]  ;;  %v1688_v28 = vand.u32 4294901760, %v1609_v0 }
  0x10   :  { %162 = vrot.lane.b32.xlu2 %v1609_v0, %s1554_s4  ;;  %s1556_s19 = smov 1   ;;  %s1557_s20 = smov 15   ;;  %v1648_v4 = vand.u32 127, %v73_v3  ;;  %v172_v9 = vperm.slane %v1650_v5, 0  ;;  %v173_v42 = vperm.slane %v1650_v5, 1  ;;  %vm241_vm6 = vcmask 588800  }
  0x11   :  { %s1558_s21 = smov 17   ;;  %v1660_v11 = vld [vmem:[#allocation3 + $0x7] ss:$8 sm:$0x3]  ;;  %v1713_v38 = vsub.f32 %v1609_v0, %v1688_v28  ;;  %s1560_s26 = smov [#allocation9]  }
  0x12   :  { %vm166_vm0 = vcmp.lt.s32.totalorder %v1648_v4, 113  ;;  %v1662_v12 = vld [vmem:[#allocation3 + $0x10] ss:$8 sm:$0x3]  ;;  %vm184_vm1 = vcmp.lt.s32.totalorder %v1648_v4, 112  ;;  %v190_v14 = vperm.slane %v1660_v11, 0 }
  0x13   :  { %vm202_vm2 = vcmp.lt.s32.totalorder %v1648_v4, 111  ;;  %v208_v15 = vperm.slane %v1662_v12, 0  ;;  %v1676_v23 = vld [vmem:[#allocation3 + $0x5] ss:$8 sm:$0x3]  ;;  %vm148_vm3 = vcmp.lt.s32.totalorder %v1648_v4, 127 }
  0x14   :  { %v154_v30 = vperm.slane %v1676_v23, 0  ;;  %v1720_v41 = vld [vmem:[#allocation3 + $0x3] ss:$8 sm:$0x3]  ;;  %v209_v49 = vperm.slane %v1662_v12, 1  ;;  %vm128_vm4 = vcmp.lt.s32.totalorder %v1648_v4, 1 }
  0x15   :  { %v1727_v44 = vld [vmem:[#allocation3 + $0x2] ss:$8 sm:$0x3]  ;;  %v134_v50 = vperm.slane %v1720_v41, 0  ;;  %v312_v51 = vand.u32 4294901760, %v1713_v38  ;;  %vm110_vm5 = vcmp.lt.s32.totalorder %v1648_v4, 15 }
  0x16   :  { %v116_v54 = vperm.slane %v1727_v44, 0  ;;  %v191_v57 = vperm.slane %v1660_v11, 1  ;;  %v155_v11 = vperm.slane %v1676_v23, 1  ;;  %vm92_vm7 = vcmp.lt.s32.totalorder %v1648_v4, 16  ;;  %s1414_s27 = sshll.u32 %s1560_s26, 4  ;;  %s1416_s30 = sshll.u32 %s2443_s6, 4  ;;  %s1415_s27 = int_to_ptr.vmem [resolvable:$true] %s1414_s27  ;;  %s1417_s30 = int_to_ptr.hbm [resolvable:$true] %s1416_s30 }
  0x17   :  { %182 = vrot.lane.b32.xlu1 %v1620_v1, %s1552_s14  ;;  %200 = vrot.lane.b32.xlu0 %v1620_v1, %s1553_s15  ;;  %v313_v3 = vsub.f32 %v1713_v38, %v312_v51  ;;  %vm75_vm8 = vcmp.lt.s32.totalorder %v1648_v4, 17 }
  0x18   :  { %164 = vrot.lane.b32.xlu2 %v1620_v1, %s1554_s4 }
  0x1f   :  { %146 = vrot.lane.b32.xlu1 %v1620_v1, %s1555_s18  ;;  %144 = vrot.lane.b32.xlu0 %v1609_v0, %s1555_s18 }
  0x20   :  { %124 = vrot.lane.b32.xlu2 %v1609_v0, %s1556_s19 }
  0x27   :  { %106 = vrot.lane.b32.xlu1 %v1609_v0, %s1557_s20  ;;  %126 = vrot.lane.b32.xlu0 %v1620_v1, %s1556_s19 }
  0x28   :  { %108 = vrot.lane.b32.xlu2 %v1620_v1, %s1557_s20 }
  0x2f   :  { %90 = vrot.lane.b32.xlu1 %v1620_v1, %s1550_s8  ;;  %88 = vrot.lane.b32.xlu0 %v1609_v0, %s1550_s8 }
  0x30   :  { %69 = vrot.lane.b32.xlu2 %v1609_v0, %s1558_s21 }
  0x37   :  { %71 = vrot.lane.b32.xlu0 %v1620_v1, %s1558_s21 }
  0x6a   :  { %v163_v2 = vpop.permute.xlu2 %162 }
  0x72   :  { %v165_v6 = vpop.permute.xlu2 %164 }
  0x73   :  { %v167_v10 = vsel %vm166_vm0, %v163_v2, %v165_v6  ;;  %v168_v45 = vsel %vm166_vm0, %v165_v6, %v163_v2 }
  0x74   :  { %v176_v13 = vmul.f32 %v172_v9, %v167_v10  ;;  %v177_v56 = vmul.f32 %v173_v42, %v168_v45 }
  0x76   :  { %v1668_v16 = vand.u32 4294901760, %v176_v13  ;;  %v1772_v9 = vand.u32 4294901760, %v177_v56 }
  0x78   :  { %v1685_v27 = vsub.f32 %v176_v13, %v1668_v16  ;;  %v1780_v13 = vld [vmem:[#allocation3 + $0x1] ss:$8 sm:$0x3] }
  0x7a   :  { %v1682_v26 = vpop.permute.xlu2 %124  ;;  %v300_v35 = vand.u32 4294901760, %v1685_v27 }
  0x7c   :  { %v301_v48 = vsub.f32 %v1685_v27, %v300_v35 }
  0x7e   :  { %v302_v62 = vand.u32 4294901760, %v301_v48 }
  0x81   :  { %v1653_v7 = vpop.permute.xlu1 %180  ;;  %v1655_v8 = vpop.permute.xlu0 %198 }
  0x82   :  { %v1747_v55 = vpop.permute.xlu2 %108 }
  0x89   :  { %v183_v17 = vpop.permute.xlu1 %182  ;;  %v201_v18 = vpop.permute.xlu0 %200 }
  0x8a   :  { %v185_v19 = vsel %vm184_vm1, %v1653_v7, %v183_v17  ;;  %v203_v20 = vsel %vm202_vm2, %v1655_v8, %v201_v18  ;;  %v204_v58 = vsel %vm202_vm2, %v201_v18, %v1655_v8  ;;  %v186_v59 = vsel %vm184_vm1, %v183_v17, %v1653_v7  ;;  %v216_v8 = vld [vmem:[#allocation6] sm:$0xff] }
  0x8b   :  { %v194_v21 = vmul.f32 %v190_v14, %v185_v19  ;;  %v212_v22 = vmul.f32 %v208_v15, %v203_v20  ;;  %v213_v5 = vmul.f32 %v209_v49, %v204_v58  ;;  %v195_v10 = vmul.f32 %v191_v57, %v186_v59 }
  0x8c   :  { %v314_v19 = vand.u32 4294901760, %v313_v3  ;;  %v243_v20 = vsel %vm241_vm6, %v216_v8, 0  ;;  %v70_v8 = vpop.permute.xlu2 %69 }
  0x8d   :  { %v1678_v24 = vand.u32 4294901760, %v194_v21  ;;  %v1680_v25 = vand.u32 4294901760, %v212_v22 }
  0x8f   :  { %253 = vmatpush.msra.mxu0 %v1680_v25  ;;  %393 = vmatpush.msra.mxu3 %v1680_v25  ;;  %v1693_v29 = vsub.f32 %v212_v22, %v1680_v25  ;;  %v1698_v31 = vsub.f32 %v194_v21, %v1678_v24  ;;  %v1790_v21 = vand.u32 4294901760, %v213_v5  ;;  %v98_v22 = vperm.slane %v1780_v13, 0 }
  0x91   :  { %v1700_v32 = vpop.permute.xlu1 %146  ;;  %255 = vmatpush.msra.mxu0 %v1678_v24  ;;  %354 = vmatpush.msra.mxu2 %v1693_v29  ;;  %v145_v33 = vpop.permute.xlu0 %144  ;;  %v288_v34 = vand.u32 4294901760, %v1693_v29  ;;  %v294_v37 = vand.u32 4294901760, %v1698_v31 }
  0x92   :  { %395 = vmatpush.msra.mxu3 %v1678_v24  ;;  %v149_v36 = vsel %vm148_vm3, %v145_v33, %v1700_v32  ;;  %v150_v14 = vsel %vm148_vm3, %v1700_v32, %v145_v33  ;;  %v1802_v32 = vand.u32 4294901760, %v195_v10 }
  0x93   :  { %v158_v39 = vmul.f32 %v154_v30, %v149_v36  ;;  %257 = vmatpush.msra.mxu0 %v1668_v16  ;;  %357 = vmatpush.msra.mxu2 %v1698_v31  ;;  %v289_v40 = vsub.f32 %v1693_v29, %v288_v34  ;;  %v295_v43 = vsub.f32 %v1698_v31, %v294_v37 }
  0x94   :  { %397 = vmatpush.msra.mxu3 %v1668_v16  ;;  %v1800_v30 = vsub.f32 %v177_v56, %v1772_v9  ;;  %v159_v33 = vmul.f32 %v155_v11, %v150_v14  ;;  %v78_v56 = vld [vmem:[#allocation3] ss:$8 sm:$0x3]  ;;  %v1833_v57 = vsub.f32 %v195_v10, %v1802_v32 }
  0x95   :  { %v1731_v46 = vand.u32 4294901760, %v158_v39  ;;  %360 = vmatpush.msra.mxu2 %v1685_v27  ;;  %v290_v47 = vand.u32 4294901760, %v289_v40  ;;  %v296_v52 = vand.u32 4294901760, %v295_v43  ;;  %v117_v40 = vperm.slane %v1727_v44, 1 }
  0x96   :  { %v1822_v44 = vand.u32 4294901760, %v1620_v1  ;;  %v1835_v58 = vand.u32 4294901760, %v159_v33 }
  0x97   :  { %259 = vmatpush.msra.mxu0 %v1731_v46  ;;  %291 = vmatpush.msra.mxu1 %v290_v47  ;;  %v1743_v53 = vsub.f32 %v158_v39, %v1731_v46  ;;  %v135_v39 = vperm.slane %v1720_v41, 1  ;;  %v1812_v47 = vand.u32 4294901760, %v243_v20 }
  0x98   :  { %399 = vmatpush.msra.mxu3 %v1731_v46 }
  0x99   :  { %v1757_v60 = vpop.permute.xlu1 %106  ;;  %297 = vmatpush.msra.mxu1 %v296_v52  ;;  %363 = vmatpush.msra.mxu2 %v1743_v53  ;;  %v127_v61 = vpop.permute.xlu0 %126  ;;  %v306_v63 = vand.u32 4294901760, %v1743_v53  ;;  %v99_v52 = vperm.slane %v1780_v13, 1  ;;  %v1847_v3 = vsub.f32 %v243_v20, %v1812_v47  ;;  %v544_v13 = vand.u32 4294901760, %v1833_v57 }
  0x9a   :  { %v130_v0 = vsel %vm128_vm4, %v127_v61, %v1682_v26  ;;  %v112_v2 = vsel %vm110_vm5, %v1747_v55, %v1757_v60  ;;  %261 = vmatpush.msra.mxu0 %v1688_v28  ;;  %401 = vmatpush.msra.mxu3 %v1688_v28  ;;  %v129_v48 = vsel %vm128_vm4, %v1682_v26, %v127_v61  ;;  %v550_v20 = vand.u32 4294901760, %v1800_v30 }
  0x9b   :  { %v138_v6 = vmul.f32 %v134_v50, %v130_v0  ;;  %v120_v7 = vmul.f32 %v116_v54, %v112_v2  ;;  %303 = vmatpush.msra.mxu1 %v302_v62  ;;  %v307_v12 = vsub.f32 %v1743_v53, %v306_v63  ;;  %366 = vmatpush.msra.mxu2 %v1713_v38 }
  0x9c   :  { %v1825_v50 = vsub.f32 %v213_v5, %v1790_v21  ;;  %v111_v59 = vsel %vm110_vm5, %v1757_v60, %v1747_v55  ;;  %v139_v62 = vmul.f32 %v135_v39, %v129_v48  ;;  %v80_v5 = vperm.slane %v78_v56, 0 }
  0x9d   :  { %v1785_v15 = vand.u32 4294901760, %v138_v6  ;;  %v1787_v17 = vand.u32 4294901760, %v120_v7  ;;  %v308_v18 = vand.u32 4294901760, %v307_v12  ;;  %v121_v55 = vmul.f32 %v117_v40, %v111_v59 }
  0x9e   :  { %v538_v11 = vand.u32 4294901760, %v1825_v50  ;;  %v1862_v12 = vsub.f32 %v159_v33, %v1835_v58  ;;  %v1866_v14 = vand.u32 4294901760, %v139_v62 }
  0x9f   :  { %263 = vmatpush.msra.mxu0 %v1785_v15  ;;  %403 = vmatpush.msra.mxu3 %v1785_v15  ;;  %v1797_v23 = vsub.f32 %v138_v6, %v1785_v15  ;;  %v1805_v36 = vsub.f32 %v120_v7, %v1787_v17  ;;  %v1852_v7 = vsub.f32 %v1620_v1, %v1822_v44  ;;  %v81_v1 = vperm.slane %v78_v56, 1 }
  0xa0   :  { %309 = vmatpush.msra.mxu1 %v308_v18  ;;  %v556_v56 = vand.u32 4294901760, %v1862_v12  ;;  %v1892_v59 = vsub.f32 %v139_v62, %v1866_v14 }
  0xa1   :  { %v91_v42 = vpop.permute.xlu1 %90  ;;  %v89_v43 = vpop.permute.xlu0 %88  ;;  %369 = vmatpush.msra.mxu2 %v1797_v23  ;;  %265 = vmatpush.msra.mxu0 %v1787_v17  ;;  %v318_v45 = vand.u32 4294901760, %v1797_v23  ;;  %v324_v41 = vand.u32 4294901760, %v1805_v36 }
  0xa2   :  { %v94_v49 = vsel %vm92_vm7, %v91_v42, %v89_v43  ;;  %315 = vmatpush.msra.mxu1 %v314_v19  ;;  %405 = vmatpush.msra.mxu3 %v1787_v17  ;;  %v93_v60 = vsel %vm92_vm7, %v89_v43, %v91_v42  ;;  %v562_v42 = vand.u32 4294901760, %v1852_v7  ;;  %v1879_v43 = vand.u32 4294901760, %v121_v55 }
  0xa3   :  { %v102_v54 = vmul.f32 %v98_v22, %v94_v49  ;;  %372 = vmatpush.msra.mxu2 %v1805_v36  ;;  %v319_v26 = vsub.f32 %v1797_v23, %v318_v45  ;;  %v325_v61 = vsub.f32 %v1805_v36, %v324_v41  ;;  %v1872_v22 = vand.u32 4294901760, %v1847_v3 }
  0xa4   :  { %v103_v33 = vmul.f32 %v99_v52, %v93_v60 }
  0xa5   :  { %v1844_v0 = vand.u32 4294901760, %v102_v54  ;;  %v320_v2 = vand.u32 4294901760, %v319_v26  ;;  %v326_v6 = vand.u32 4294901760, %v325_v61  ;;  %v545_v26 = vsub.f32 %v1833_v57, %v544_v13 }
  0xa6   :  { %v1898_v60 = vand.u32 4294901760, %v103_v33 }
  0xa7   :  { %267 = vmatpush.msra.mxu0 %v1844_v0  ;;  %321 = vmatpush.msra.mxu1 %v320_v2  ;;  %v1858_v10 = vsub.f32 %v102_v54, %v1844_v0  ;;  %v539_v54 = vsub.f32 %v1825_v50, %v538_v11 }
  0xa8   :  { %407 = vmatpush.msra.mxu3 %v1844_v0 }
  0xa9   :  { %v72_v18 = vpop.permute.xlu0 %71  ;;  %327 = vmatpush.msra.mxu1 %v326_v6  ;;  %375 = vmatpush.msra.mxu2 %v1858_v10  ;;  %v330_v19 = vand.u32 4294901760, %v1858_v10  ;;  %v1559_v6 = vmov 0  }
  0xaa   :  { %v76_v39 = vsel %vm75_vm8, %v70_v8, %v72_v18  ;;  %v77_v40 = vsel %vm75_vm8, %v72_v18, %v70_v8  ;;  %1441 = vset.pattern.permute.xlu1 %v1559_v6  ;;  %1442 = vset.pattern.permute.xlu0 %v1559_v6  ;;  %v1901_v8 = vsub.f32 %v121_v55, %v1879_v43 }
  0xab   :  { %v84_v48 = vmul.f32 %v80_v5, %v77_v40  ;;  %v331_v49 = vsub.f32 %v1858_v10, %v330_v19  ;;  %v85_v52 = vmul.f32 %v81_v1, %v76_v39  ;;  %v273_v5 = vsub.f32 %v1847_v3, %v1872_v22 }
  0xac   :  { %v540_v1 = vand.u32 4294901760, %v539_v54  ;;  %v551_v18 = vsub.f32 %v1800_v30, %v550_v20  ;;  %v546_v40 = vand.u32 4294901760, %v545_v26  ;;  %v563_v55 = vsub.f32 %v1852_v7, %v562_v42 }
  0xad   :  { %v1894_v61 = vand.u32 4294901760, %v84_v48  ;;  %v332_v2 = vand.u32 4294901760, %v331_v49  ;;  %v1908_v39 = vand.u32 4294901760, %v85_v52  ;;  %v568_v54 = vand.u32 4294901760, %v1892_v59 }
  0xae   :  { %v1921_v6 = vsub.f32 %v103_v33, %v1898_v60  ;;  %v552_v29 = vand.u32 4294901760, %v551_v18  ;;  %v574_v26 = vand.u32 4294901760, %v1901_v8  ;;  %v564_v33 = vand.u32 4294901760, %v563_v55 }
  0xaf   :  { %269 = vmatpush.msra.mxu0 %v1894_v61  ;;  %333 = vmatpush.msra.mxu1 %v332_v2  ;;  %v335_v62 = vsub.f32 %v84_v48, %v1894_v61  ;;  %v557_v48 = vsub.f32 %v1862_v12, %v556_v56  ;;  %v274_v2 = vand.u32 4294901760, %v273_v5  ;;  %v569_v5 = vsub.f32 %v1892_v59, %v568_v54 }
  0xb0   :  { %409 = vmatpush.msra.mxu3 %v1894_v61  ;;  %v575_v27 = vsub.f32 %v1901_v8, %v574_v26 }
  0xb1   :  { %427 = vmatpush.msrb.mxu0 %v288_v34  ;;  %378 = vmatpush.msra.mxu2 %v335_v62  ;;  %v336_v49 = vand.u32 4294901760, %v335_v62  ;;  %v558_v31 = vand.u32 4294901760, %v557_v48  ;;  %v570_v53 = vand.u32 4294901760, %v569_v5 }
  0xb2   :  { %541 = vmatpush.msrb.mxu3 %v540_v1  ;;  %381 = vmatmul.f32.vlgmr.msra.gmra.mxu2 %v1847_v3  ;;  %v1929_v1 = vsub.f32 %v85_v52, %v1908_v39  ;;  %v580_v52 = vand.u32 4294901760, %v1921_v6  ;;  %v576_v38 = vand.u32 4294901760, %v575_v27 }
  0xb3   :  { %431 = vmatpush.msrb.mxu0 %v294_v37  ;;  %503 = vmatpush.msrb.mxu2 %v1790_v21  ;;  %v337_v34 = vsub.f32 %v335_v62, %v336_v49 }
  0xb4   :  { %547 = vmatpush.msrb.mxu3 %v546_v40  ;;  %275 = vmatmul.f32.vlgmr.msra.gmra.mxu0 %v274_v2 }
  0xb5   :  { %435 = vmatpush.msrb.mxu0 %v300_v35  ;;  %505 = vmatpush.msrb.mxu2 %v1802_v32  ;;  %v338_v37 = vand.u32 4294901760, %v337_v34  ;;  %v586_v35 = vand.u32 4294901760, %v1929_v1 }
  0xb6   :  { %553 = vmatpush.msrb.mxu3 %v552_v29  ;;  %v877_v29 = vld [vmem:[#allocation8] sm:$0xff] }
  0xb7   :  { %439 = vmatpush.msrb.mxu0 %v306_v63  ;;  %507 = vmatpush.msrb.mxu2 %v1772_v9  ;;  %v581_v63 = vsub.f32 %v1921_v6, %v580_v52 }
  0xb8   :  { %559 = vmatpush.msrb.mxu3 %v558_v31  ;;  %339 = vmatpush.msra.mxu1 %v338_v37 }
  0xb9   :  { %443 = vmatpush.msrb.mxu0 %v312_v51  ;;  %509 = vmatpush.msrb.mxu2 %v1835_v58 }
  0xba   :  { %473 = vmatpush.msrb.mxu1 %v1680_v25  ;;  %565 = vmatpush.msrb.mxu3 %v564_v33  ;;  %v587_v25 = vsub.f32 %v1929_v1, %v586_v35 }
  0xbb   :  { %447 = vmatpush.msrb.mxu0 %v318_v45  ;;  %511 = vmatpush.msrb.mxu2 %v1822_v44 }
  0xbc   :  { %475 = vmatpush.msrb.mxu1 %v1678_v24  ;;  %571 = vmatpush.msrb.mxu3 %v570_v53  ;;  %v582_v24 = vand.u32 4294901760, %v581_v63 }
  0xbd   :  { %451 = vmatpush.msrb.mxu0 %v324_v41  ;;  %513 = vmatpush.msrb.mxu2 %v1866_v14 }
  0xbe   :  { %477 = vmatpush.msrb.mxu1 %v1668_v16  ;;  %577 = vmatpush.msrb.mxu3 %v576_v38  ;;  %v588_v16 = vand.u32 4294901760, %v587_v25 }
  0xbf   :  { %413 = vmatmul.f32.vlgmr.msra.gmra.mxu3 %v1872_v22  ;;  %455 = vmatpush.msrb.mxu0 %v330_v19 }
  0xc0   :  { %479 = vmatpush.msrb.mxu1 %v1731_v46  ;;  %515 = vmatpush.msrb.mxu2 %v1879_v43 }
  0xc1   :  { %583 = vmatpush.msrb.mxu3 %v582_v24  ;;  %459 = vmatpush.msrb.mxu0 %v336_v49 }
  0xc2   :  { %481 = vmatpush.msrb.mxu1 %v1688_v28  ;;  %517 = vmatpush.msrb.mxu2 %v1898_v60  ;;  %v235_v28 = vld [vmem:[%s2440_s3] sm:$0xff] }
  0xc3   :  { %589 = vmatpush.msrb.mxu3 %v588_v16  ;;  %341 = vmatmul.f32.vlgmr.msra.gmra.mxu1 %v1812_v47 }
  0xc4   :  { %604 = vmatpush.msra.mxu0 %v1825_v50  ;;  %483 = vmatpush.msrb.mxu1 %v1785_v15 }
  0xc5   :  { %723 = vmatpush.msra.mxu3 %v1790_v21  ;;  %519 = vmatpush.msrb.mxu2 %v1908_v39 }
  0xc6   :  { %525 = vmatmul.f32.vlgmr.msrb.gmra.mxu2 %v274_v2  ;;  %607 = vmatpush.msra.mxu0 %v1833_v57  ;;  %v835_v2 = vld [vmem:[#allocation3 + $0x6] ss:$8 sm:$0x3] }
  0xc7   :  { %677 = vmatpush.msra.mxu2 %v538_v11  ;;  %725 = vmatpush.msra.mxu3 %v1802_v32  ;;  %v837_v37 = vperm.slane %v835_v2, 0 }
  0xc8   :  { %485 = vmatpush.msrb.mxu1 %v1787_v17  ;;  %591 = vmatmul.f32.vlgmr.msrb.gmra.mxu3 %v1812_v47 }
  0xc9   :  { %610 = vmatpush.msra.mxu0 %v1800_v30  ;;  %681 = vmatpush.msra.mxu2 %v544_v13 }
  0xca   :  { %727 = vmatpush.msra.mxu3 %v1772_v9  ;;  %487 = vmatpush.msrb.mxu1 %v1844_v0 }
  0xcb   :  { %461 = vmatmul.f32.vlgmr.msrb.gmra.mxu0 %v1812_v47  ;;  %685 = vmatpush.msra.mxu2 %v550_v20 }
  0xcc   :  { %613 = vmatpush.msra.mxu0 %v1862_v12  ;;  %729 = vmatpush.msra.mxu3 %v1835_v58 }
  0xcd   :  { %489 = vmatpush.msrb.mxu1 %v1894_v61  ;;  %689 = vmatpush.msra.mxu2 %v556_v56 }
  0xce   :  { %491 = vmatmul.f32.vlgmr.msrb.gmra.mxu1 %v1812_v47  ;;  %616 = vmatpush.msra.mxu0 %v1852_v7 }
  0xcf   :  { %643 = vmatpush.msra.mxu1 %v1790_v21  ;;  %731 = vmatpush.msra.mxu3 %v1822_v44 }
  0xd0   :  { %238 = vperm.xlu1 %1441, %v235_v28   ;;  %619 = vmatpush.msra.mxu0 %v1892_v59 }
  0xd1   :  { %645 = vmatpush.msra.mxu1 %v1802_v32  ;;  %693 = vmatpush.msra.mxu2 %v562_v42 }
  0xd2   :  { %733 = vmatpush.msra.mxu3 %v1866_v14  ;;  %622 = vmatpush.msra.mxu0 %v1901_v8 }
  0xd3   :  { %647 = vmatpush.msra.mxu1 %v1772_v9  ;;  %697 = vmatpush.msra.mxu2 %v568_v54  ;;  %v867_v54 = vld [vmem:[#allocation3 + $0x10] ss:$8 sm:$0x3] }
  0xd4   :  { %735 = vmatpush.msra.mxu3 %v1879_v43  ;;  %625 = vmatpush.msra.mxu0 %v1921_v6  ;;  %v869_v31 = vperm.slane %v867_v54, 0  ;;  %v870_v53 = vperm.slane %v867_v54, 1 }
  0xd5   :  { %649 = vmatpush.msra.mxu1 %v1835_v58  ;;  %701 = vmatpush.msra.mxu2 %v574_v26  ;;  %v2075_v26 = vld [vmem:[#allocation3 + $0x3] ss:$8 sm:$0x3] }
  0xd6   :  { %737 = vmatpush.msra.mxu3 %v1898_v60  ;;  %628 = vmatpush.msra.mxu0 %v1929_v1 }
  0xd7   :  { %651 = vmatpush.msra.mxu1 %v1822_v44  ;;  %705 = vmatpush.msra.mxu2 %v580_v52  ;;  %v2085_v52 = vsel %vm241_vm6, %v877_v29, 0  ;;  %v2153_v29 = vld [vmem:[#allocation3] ss:$8 sm:$0x3] }
  0xd8   :  { %739 = vmatpush.msra.mxu3 %v1908_v39  ;;  %631 = vmatmul.f32.vlgmr.msra.gmra.mxu0 %v1847_v3 }
  0xd9   :  { %653 = vmatpush.msra.mxu1 %v1866_v14  ;;  %709 = vmatpush.msra.mxu2 %v586_v35  ;;  %v803_v35 = vperm.slane %v2075_v26, 0 }
  0xda   :  { %711 = vmatmul.f32.vlgmr.msra.gmra.mxu2 %v1812_v47  ;;  %741 = vmatmul.f32.vlgmr.msra.gmra.mxu3 %v1812_v47 }
  0xdb   :  { %655 = vmatpush.msra.mxu1 %v1879_v43 }
  0xdd   :  { %657 = vmatpush.msra.mxu1 %v1898_v60  ;;  %v851_v60 = vld [vmem:[#allocation3 + $0x7] ss:$8 sm:$0x3] }
  0xde   :  { %v853_v18 = vperm.slane %v851_v60, 0  ;;  %v854_v6 = vperm.slane %v851_v60, 1 }
  0xdf   :  { %659 = vmatpush.msra.mxu1 %v1908_v39 }
  0xe0   :  { %663 = vmatmul.f32.vlgmr.msra.gmra.mxu1 %v1872_v22 }
 0x131   :  { %v276_v46 = vpop.f32.mrf.mxu0 }
 0x135   :  { %v382_v21 = vpop.f32.mrf.mxu2 }
 0x140   :  { %v342_v51 = vpop.f32.mrf.mxu1 }
 0x142   :  { %v239_v9 = vpop.permute.xlu1 %238  ;;  %v414_v30 = vpop.f32.mrf.mxu3 }
 0x143   :  { %v277_v15 = vadd.f32 %v276_v46, %v239_v9 }
 0x145   :  { %v343_v17 = vadd.f32 %v342_v51, %v277_v15 }
 0x147   :  { %v383_v23 = vadd.f32 %v382_v21, %v343_v17  ;;  %v819_v17 = vld [vmem:[#allocation3 + $0x5] ss:$8 sm:$0x3]  ;;  %v2101_v21 = vld [vmem:[#allocation3 + $0x2] ss:$8 sm:$0x3] }
 0x148   :  { %v462_v32 = vpop.f32.mrf.mxu0 }
 0x149   :  { %v415_v36 = vadd.f32 %v414_v30, %v383_v23  ;;  %v526_v50 = vpop.f32.mrf.mxu2 }
 0x14a   :  { %v527_v57 = vadd.f32 %v526_v50, %v239_v9  ;;  %v2113_v50 = vld [vmem:[#allocation3 + $0x1] ss:$8 sm:$0x3] }
 0x14b   :  { %v463_v45 = vadd.f32 %v462_v32, %v415_v36  ;;  %v492_v47 = vpop.f32.mrf.mxu1  ;;  %v592_v58 = vpop.f32.mrf.mxu3 }
 0x14c   :  { %v593_v3 = vadd.f32 %v592_v58, %v527_v57  ;;  %v821_v58 = vperm.slane %v819_v17, 0 }
 0x14d   :  { %v493_v41 = vadd.f32 %v492_v47, %v463_v45 }
 0x14f   :  { %v745_v44 = vmax.f32 %v493_v41, 0.0  ;;  %v804_v41 = vperm.slane %v2075_v26, 1 }
 0x151   :  { %829 = vrot.lane.b32.xlu0 %v745_v44, %s1554_s4  ;;  %845 = vrot.lane.b32.xlu1 %v745_v44, %s1552_s14  ;;  %v2061_v61 = vand.u32 4294901760, %v745_v44 }
 0x152   :  { %861 = vrot.lane.b32.xlu2 %v745_v44, %s1553_s15 }
 0x153   :  { %v2064_v62 = vsub.f32 %v745_v44, %v2061_v61 }
 0x155   :  { %v632_v0 = vpop.f32.mrf.mxu0  ;;  %v972_v48 = vand.u32 4294901760, %v2064_v62 }
 0x156   :  { %v633_v7 = vadd.f32 %v632_v0, %v593_v3  ;;  %v822_v0 = vperm.slane %v819_v17, 1  ;;  %v787_v3 = vperm.slane %v2101_v21, 0 }
 0x157   :  { %v2080_v33 = vsub.f32 %v2064_v62, %v972_v48 }
 0x159   :  { %779 = vrot.lane.b32.xlu0 %v745_v44, %s1557_s20  ;;  %795 = vrot.lane.b32.xlu1 %v745_v44, %s1556_s19  ;;  %v974_v9 = vand.u32 4294901760, %v2080_v33 }
 0x15a   :  { %813 = vrot.lane.b32.xlu2 %v745_v44, %s1555_s18 }
 0x15d   :  { %v664_v10 = vpop.f32.mrf.mxu1  ;;  %v712_v11 = vpop.f32.mrf.mxu2 }
 0x15e   :  { %v665_v12 = vadd.f32 %v664_v10, %v633_v7  ;;  %v742_v13 = vpop.f32.mrf.mxu3  ;;  %v788_v10 = vperm.slane %v2101_v21, 1 }
 0x160   :  { %v713_v14 = vadd.f32 %v712_v11, %v665_v12 }
 0x162   :  { %v743_v19 = vadd.f32 %v742_v13, %v713_v14  ;;  %763 = vrot.lane.b32.xlu2 %v745_v44, %s1550_s8 }
 0x164   :  { %v2038_v20 = vmax.f32 %v743_v19, 0.0 }
 0x166   :  { %863 = vrot.lane.b32.xlu0 %v2038_v20, %s1553_s15  ;;  %831 = vrot.lane.b32.xlu1 %v2038_v20, %s1554_s4  ;;  %v2099_v15 = vand.u32 4294901760, %v2038_v20 }
 0x16a   :  { %847 = vrot.lane.b32.xlu2 %v2038_v20, %s1552_s14 }
 0x16e   :  { %815 = vrot.lane.b32.xlu0 %v2038_v20, %s1555_s18  ;;  %781 = vrot.lane.b32.xlu1 %v2038_v20, %s1557_s20 }
 0x172   :  { %797 = vrot.lane.b32.xlu2 %v2038_v20, %s1556_s19 }
 0x176   :  { %765 = vrot.lane.b32.xlu0 %v2038_v20, %s1550_s8  ;;  %747 = vrot.lane.b32.xlu1 %v745_v44, %s1558_s21  ;;  %v838_v44 = vperm.slane %v835_v2, 1 }
 0x17a   :  { %749 = vrot.lane.b32.xlu2 %v2038_v20, %s1558_s21 }
 0x1ac   :  { %v862_v22 = vpop.permute.xlu2 %861 }
 0x1b4   :  { %v2057_v42 = vpop.permute.xlu2 %813 }
 0x1bc   :  { %v2059_v43 = vpop.permute.xlu2 %763 }
 0x1c3   :  { %v830_v56 = vpop.permute.xlu0 %829  ;;  %v846_v59 = vpop.permute.xlu1 %845 }
 0x1c4   :  { %v848_v8 = vpop.permute.xlu2 %847 }
 0x1c5   :  { %v849_v39 = vsel %vm184_vm1, %v846_v59, %v848_v8  ;;  %v850_v34 = vsel %vm184_vm1, %v848_v8, %v846_v59 }
 0x1c6   :  { %v857_v49 = vmul.f32 %v853_v18, %v849_v39  ;;  %v858_v27 = vmul.f32 %v854_v6, %v850_v34 }
 0x1c8   :  { %v2082_v5 = vand.u32 4294901760, %v857_v49  ;;  %v2110_v47 = vand.u32 4294901760, %v858_v27 }
 0x1ca   :  { %v2104_v23 = vsub.f32 %v857_v49, %v2082_v5  ;;  %v2137_v60 = vsub.f32 %v858_v27, %v2110_v47 }
 0x1cb   :  { %v2068_v40 = vpop.permute.xlu0 %779  ;;  %v2070_v55 = vpop.permute.xlu1 %795 }
 0x1cc   :  { %v798_v1 = vpop.permute.xlu2 %797  ;;  %v954_v12 = vand.u32 4294901760, %v2104_v23 }
 0x1cd   :  { %v800_v25 = vsel %vm128_vm4, %v798_v1, %v2070_v55  ;;  %v799_v49 = vsel %vm128_vm4, %v2070_v55, %v798_v1 }
 0x1ce   :  { %v807_v30 = vmul.f32 %v803_v35, %v800_v25  ;;  %v955_v55 = vsub.f32 %v2104_v23, %v954_v12 }
 0x1d0   :  { %v2128_v13 = vand.u32 4294901760, %v807_v30 }
 0x1d2   :  { %v2172_v27 = vsub.f32 %v807_v30, %v2128_v13 }
 0x1d8   :  { %v864_v63 = vpop.permute.xlu0 %863  ;;  %v832_v38 = vpop.permute.xlu1 %831 }
 0x1d9   :  { %v865_v24 = vsel %vm202_vm2, %v862_v22, %v864_v63  ;;  %v866_v16 = vsel %vm202_vm2, %v864_v63, %v862_v22  ;;  %v833_v28 = vsel %vm166_vm0, %v830_v56, %v832_v38  ;;  %v834_v7 = vsel %vm166_vm0, %v832_v38, %v830_v56 }
 0x1da   :  { %v873_v46 = vmul.f32 %v869_v31, %v865_v24  ;;  %v841_v51 = vmul.f32 %v837_v37, %v833_v28  ;;  %v874_v32 = vmul.f32 %v870_v53, %v866_v16  ;;  %v771_v56 = vperm.slane %v2113_v50, 0 }
 0x1db   :  { %v842_v54 = vmul.f32 %v838_v44, %v834_v7  ;;  %v772_v53 = vperm.slane %v2113_v50, 1  ;;  %v755_v63 = vperm.slane %v2153_v29, 0  ;;  %v756_v24 = vperm.slane %v2153_v29, 1 }
 0x1dc   :  { %v2106_v36 = vand.u32 4294901760, %v873_v46  ;;  %v2108_v45 = vand.u32 4294901760, %v841_v51  ;;  %v2131_v19 = vand.u32 4294901760, %v874_v32  ;;  %v1204_v28 = vand.u32 4294901760, %v2137_v60 }
 0x1dd   :  { %v2180_v25 = vand.u32 4294901760, %v842_v54 }
 0x1de   :  { %v2116_v57 = vsub.f32 %v873_v46, %v2106_v36  ;;  %913 = vmatpush.msrb.mxu0 %v2106_v36  ;;  %1053 = vmatpush.msrb.mxu3 %v2106_v36  ;;  %v2125_v11 = vsub.f32 %v841_v51, %v2108_v45  ;;  %v2165_v1 = vsub.f32 %v874_v32, %v2131_v19  ;;  %v750_v51 = vpop.permute.xlu2 %749  ;;  %v956_v32 = vand.u32 4294901760, %v955_v55 }
 0x1df   :  { %v808_v46 = vmul.f32 %v804_v41, %v799_v49  ;;  %v2243_v55 = vsub.f32 %v2038_v20, %v2099_v15 }
 0x1e0   :  { %v948_v14 = vand.u32 4294901760, %v2116_v57  ;;  %v816_v22 = vpop.permute.xlu0 %815  ;;  %v782_v59 = vpop.permute.xlu1 %781  ;;  %915 = vmatpush.msrb.mxu0 %v2082_v5  ;;  %1014 = vmatpush.msrb.mxu2 %v2116_v57  ;;  %v960_v26 = vand.u32 4294901760, %v2125_v11  ;;  %v1198_v44 = vand.u32 4294901760, %v2165_v1 }
 0x1e1   :  { %v817_v8 = vsel %vm148_vm3, %v2057_v42, %v816_v22  ;;  %v818_v18 = vsel %vm148_vm3, %v816_v22, %v2057_v42  ;;  %v784_v39 = vsel %vm110_vm5, %v782_v59, %v2068_v40  ;;  %1055 = vmatpush.msrb.mxu3 %v2082_v5  ;;  %v783_v30 = vsel %vm110_vm5, %v2068_v40, %v782_v59 }
 0x1e2   :  { %v825_v2 = vmul.f32 %v821_v58, %v817_v8  ;;  %v791_v6 = vmul.f32 %v787_v3, %v784_v39  ;;  %917 = vmatpush.msrb.mxu0 %v2108_v45  ;;  %v826_v34 = vmul.f32 %v822_v0, %v818_v18  ;;  %1017 = vmatpush.msrb.mxu2 %v2104_v23  ;;  %v978_v3 = vand.u32 4294901760, %v2172_v27 }
 0x1e3   :  { %1057 = vmatpush.msrb.mxu3 %v2108_v45  ;;  %v949_v42 = vsub.f32 %v2116_v57, %v948_v14  ;;  %v961_v38 = vsub.f32 %v2125_v11, %v960_v26  ;;  %v2211_v8 = vsub.f32 %v842_v54, %v2180_v25  ;;  %v792_v18 = vmul.f32 %v788_v10, %v783_v30 }
 0x1e4   :  { %v2167_v31 = vand.u32 4294901760, %v825_v2  ;;  %v2169_v37 = vand.u32 4294901760, %v791_v6  ;;  %1020 = vmatpush.msrb.mxu2 %v2125_v11  ;;  %v2189_v17 = vand.u32 4294901760, %v826_v34 }
 0x1e5   :  { %v950_v35 = vand.u32 4294901760, %v949_v42  ;;  %v962_v59 = vand.u32 4294901760, %v961_v38  ;;  %v979_v42 = vsub.f32 %v2172_v27, %v978_v3  ;;  %v1210_v38 = vand.u32 4294901760, %v2211_v8 }
 0x1e6   :  { %919 = vmatpush.msrb.mxu0 %v2167_v31  ;;  %1059 = vmatpush.msrb.mxu3 %v2167_v31  ;;  %v2186_v16 = vsub.f32 %v825_v2, %v2167_v31  ;;  %v2199_v41 = vsub.f32 %v791_v6, %v2169_v37  ;;  %v2216_v2 = vand.u32 4294901760, %v808_v46  ;;  %v2219_v6 = vsub.f32 %v826_v34, %v2189_v17 }
 0x1e7   :  { %951 = vmatpush.msrb.mxu1 %v950_v35  ;;  %v1199_v34 = vsub.f32 %v2165_v1, %v1198_v44  ;;  %v2245_v35 = vand.u32 4294901760, %v792_v18  ;;  %v1211_v33 = vsub.f32 %v2211_v8, %v1210_v38 }
 0x1e8   :  { %v766_v50 = vpop.permute.xlu0 %765  ;;  %v748_v58 = vpop.permute.xlu1 %747  ;;  %921 = vmatpush.msrb.mxu0 %v2061_v61  ;;  %1023 = vmatpush.msrb.mxu2 %v2186_v16  ;;  %v966_v0 = vand.u32 4294901760, %v2186_v16  ;;  %v984_v29 = vand.u32 4294901760, %v2199_v41  ;;  %v1216_v30 = vand.u32 4294901760, %v2219_v6 }
 0x1e9   :  { %v767_v40 = vsel %vm92_vm7, %v2059_v43, %v766_v50  ;;  %v768_v7 = vsel %vm92_vm7, %v766_v50, %v2059_v43  ;;  %v752_v22 = vsel %vm75_vm8, %v750_v51, %v748_v58  ;;  %957 = vmatpush.msrb.mxu1 %v956_v32  ;;  %1061 = vmatpush.msrb.mxu3 %v2061_v61  ;;  %v2265_v32 = vand.u32 4294901760, %v2085_v52 }
 0x1ea   :  { %v775_v39 = vmul.f32 %v771_v56, %v768_v7  ;;  %v759_v49 = vmul.f32 %v755_v63, %v752_v22  ;;  %v751_v43 = vsel %vm75_vm8, %v748_v58, %v750_v51  ;;  %923 = vmatpush.msrb.mxu0 %v2128_v13  ;;  %v967_v21 = vsub.f32 %v2186_v16, %v966_v0 }
 0x1eb   :  { %963 = vmatpush.msrb.mxu1 %v962_v59  ;;  %v776_v10 = vmul.f32 %v772_v53, %v767_v40  ;;  %1026 = vmatpush.msrb.mxu2 %v2064_v62  ;;  %v760_v53 = vmul.f32 %v756_v24, %v751_v43  ;;  %v2254_v51 = vsub.f32 %v808_v46, %v2216_v2  ;;  %v1200_v40 = vand.u32 4294901760, %v1199_v34 }
 0x1ec   :  { %v2227_v56 = vand.u32 4294901760, %v775_v39  ;;  %v2229_v54 = vand.u32 4294901760, %v759_v49  ;;  %1063 = vmatpush.msrb.mxu3 %v2128_v13  ;;  %925 = vmatpush.msrb.mxu0 %v2169_v37  ;;  %v968_v4 = vand.u32 4294901760, %v967_v21  ;;  %v1205_v24 = vsub.f32 %v2137_v60, %v1204_v28 }
 0x1ed   :  { %1029 = vmatpush.msrb.mxu2 %v2172_v27  ;;  %v2267_v50 = vand.u32 4294901760, %v776_v10  ;;  %v985_v46 = vsub.f32 %v2199_v41, %v984_v29  ;;  %v980_v7 = vand.u32 4294901760, %v979_v42  ;;  %v1222_v59 = vand.u32 4294901760, %v2243_v55 }
 0x1ee   :  { %1065 = vmatpush.msrb.mxu3 %v2169_v37  ;;  %v2250_v63 = vsub.f32 %v775_v39, %v2227_v56  ;;  %927 = vmatpush.msrb.mxu0 %v2227_v56  ;;  %v2258_v20 = vsub.f32 %v759_v49, %v2229_v54  ;;  %v2281_v39 = vsub.f32 %v792_v18, %v2245_v35  ;;  %v2283_v49 = vand.u32 4294901760, %v760_v53 }
 0x1ef   :  { %969 = vmatpush.msrb.mxu1 %v968_v4  ;;  %1032 = vmatpush.msrb.mxu2 %v2199_v41  ;;  %v1206_v18 = vand.u32 4294901760, %v1205_v24  ;;  %v1217_v43 = vsub.f32 %v2219_v6, %v1216_v30  ;;  %v1228_v21 = vand.u32 4294901760, %v2254_v51  ;;  %v2300_v4 = vsub.f32 %v776_v10, %v2267_v50 }
 0x1f0   :  { %1067 = vmatpush.msrb.mxu3 %v2227_v56  ;;  %v990_v58 = vand.u32 4294901760, %v2250_v63  ;;  %929 = vmatpush.msrb.mxu0 %v2229_v54  ;;  %v996_v22 = vand.u32 4294901760, %v2258_v20  ;;  %v986_v34 = vand.u32 4294901760, %v985_v46  ;;  %v2314_v10 = vsub.f32 %v760_v53, %v2283_v49 }
 0x1f1   :  { %975 = vmatpush.msrb.mxu1 %v974_v9  ;;  %1035 = vmatpush.msrb.mxu2 %v2250_v63  ;;  %v1212_v24 = vand.u32 4294901760, %v1211_v33  ;;  %v1223_v46 = vsub.f32 %v2243_v55, %v1222_v59  ;;  %v1240_v53 = vand.u32 4294901760, %v2300_v4 }
 0x1f2   :  { %1069 = vmatpush.msrb.mxu3 %v2229_v54  ;;  %v991_v9 = vsub.f32 %v2250_v63, %v990_v58  ;;  %1087 = vmatpush.msra.mxu0 %v948_v14  ;;  %v997_v57 = vsub.f32 %v2258_v20, %v996_v22  ;;  %v2308_v14 = vsub.f32 %v2085_v52, %v2265_v32  ;;  %v1218_v52 = vand.u32 4294901760, %v1217_v43 }
 0x1f3   :  { %981 = vmatpush.msrb.mxu1 %v980_v7  ;;  %1038 = vmatpush.msrb.mxu2 %v2258_v20  ;;  %v1246_v33 = vand.u32 4294901760, %v2314_v10 }
 0x1f4   :  { %1201 = vmatpush.msra.mxu3 %v1200_v40  ;;  %v992_v42 = vand.u32 4294901760, %v991_v9  ;;  %1091 = vmatpush.msra.mxu0 %v954_v12  ;;  %v1234_v40 = vand.u32 4294901760, %v2281_v39  ;;  %v998_v23 = vand.u32 4294901760, %v997_v57  ;;  %v1229_v12 = vsub.f32 %v2254_v51, %v1228_v21 }
 0x1f5   :  { %1163 = vmatpush.msra.mxu2 %v2131_v19  ;;  %987 = vmatpush.msrb.mxu1 %v986_v34  ;;  %v2331_v11 = vand.u32 4294901760, %v2308_v14 }
 0x1f6   :  { %1207 = vmatpush.msra.mxu3 %v1206_v18  ;;  %1095 = vmatpush.msra.mxu0 %v960_v26  ;;  %v1224_v26 = vand.u32 4294901760, %v1223_v46  ;;  %v1235_v7 = vsub.f32 %v2281_v39, %v1234_v40  ;;  %v1230_v16 = vand.u32 4294901760, %v1229_v12 }
 0x1f7   :  { %1165 = vmatpush.msra.mxu2 %v2110_v47  ;;  %993 = vmatpush.msrb.mxu1 %v992_v42  ;;  %v933_v9 = vsub.f32 %v2308_v14, %v2331_v11 }
 0x1f8   :  { %1213 = vmatpush.msra.mxu3 %v1212_v24  ;;  %1099 = vmatpush.msra.mxu0 %v966_v0  ;;  %v1241_v0 = vsub.f32 %v2300_v4, %v1240_v53  ;;  %v1236_v62 = vand.u32 4294901760, %v1235_v7 }
 0x1f9   :  { %1167 = vmatpush.msra.mxu2 %v2180_v25  ;;  %999 = vmatpush.msrb.mxu1 %v998_v23 }
 0x1fa   :  { %1219 = vmatpush.msra.mxu3 %v1218_v52  ;;  %1103 = vmatpush.msra.mxu0 %v972_v48  ;;  %v1247_v48 = vsub.f32 %v2314_v10, %v1246_v33 }
 0x1fb   :  { %1133 = vmatpush.msra.mxu1 %v2106_v36  ;;  %1169 = vmatpush.msra.mxu2 %v2189_v17  ;;  %v934_v36 = vand.u32 4294901760, %v933_v9 }
 0x1fc   :  { %1225 = vmatpush.msra.mxu3 %v1224_v26  ;;  %1107 = vmatpush.msra.mxu0 %v978_v3  ;;  %v1248_v27 = vand.u32 4294901760, %v1247_v48 }
 0x1fd   :  { %1135 = vmatpush.msra.mxu1 %v2082_v5  ;;  %1171 = vmatpush.msra.mxu2 %v2099_v15  ;;  %v1242_v5 = vand.u32 4294901760, %v1241_v0 }
 0x1fe   :  { %1231 = vmatpush.msra.mxu3 %v1230_v16  ;;  %1111 = vmatpush.msra.mxu0 %v984_v29 }
 0x1ff   :  { %1137 = vmatpush.msra.mxu1 %v2108_v45  ;;  %1173 = vmatpush.msra.mxu2 %v2216_v2 }
 0x200   :  { %1237 = vmatpush.msra.mxu3 %v1236_v62  ;;  %1115 = vmatpush.msra.mxu0 %v990_v58 }
 0x201   :  { %1139 = vmatpush.msra.mxu1 %v2167_v31  ;;  %1175 = vmatpush.msra.mxu2 %v2245_v35 }
 0x202   :  { %1243 = vmatpush.msra.mxu3 %v1242_v5  ;;  %1119 = vmatpush.msra.mxu0 %v996_v22 }
 0x203   :  { %1141 = vmatpush.msra.mxu1 %v2061_v61  ;;  %1177 = vmatpush.msra.mxu2 %v2267_v50  ;;  %v896_v61 = vld [vmem:[%s2442_s5] sm:$0xff] }
 0x204   :  { %1249 = vmatpush.msra.mxu3 %v1248_v27  ;;  %935 = vmatmul.f32.vlgmr.msrb.gmra.mxu0 %v934_v36 }
 0x205   :  { %1073 = vmatmul.f32.vlgmr.msrb.gmra.mxu3 %v2331_v11  ;;  %1264 = vmatpush.msrb.mxu0 %v2165_v1 }
 0x206   :  { %1383 = vmatpush.msrb.mxu3 %v2131_v19  ;;  %1143 = vmatpush.msra.mxu1 %v2128_v13 }
 0x207   :  { %1179 = vmatpush.msra.mxu2 %v2283_v49  ;;  %1267 = vmatpush.msrb.mxu0 %v2137_v60 }
 0x208   :  { %1041 = vmatmul.f32.vlgmr.msrb.gmra.mxu2 %v2308_v14  ;;  %1385 = vmatpush.msrb.mxu3 %v2110_v47 }
 0x209   :  { %1337 = vmatpush.msrb.mxu2 %v1198_v44  ;;  %1145 = vmatpush.msra.mxu1 %v2169_v37 }
 0x20a   :  { %1270 = vmatpush.msrb.mxu0 %v2211_v8  ;;  %1387 = vmatpush.msrb.mxu3 %v2180_v25  ;;  %v1443_v8 = vld [vmem:[%s2437_s0] sm:$0xff] }
 0x20b   :  { %1341 = vmatpush.msrb.mxu2 %v1204_v28  ;;  %1147 = vmatpush.msra.mxu1 %v2227_v56 }
 0x20c   :  { %1273 = vmatpush.msrb.mxu0 %v2219_v6  ;;  %1389 = vmatpush.msrb.mxu3 %v2189_v17 }
 0x20d   :  { %1345 = vmatpush.msrb.mxu2 %v1210_v38  ;;  %1149 = vmatpush.msra.mxu1 %v2229_v54 }
 0x20e   :  { %1276 = vmatpush.msrb.mxu0 %v2243_v55  ;;  %1001 = vmatmul.f32.vlgmr.msrb.gmra.mxu1 %v2265_v32 }
 0x20f   :  { %1349 = vmatpush.msrb.mxu2 %v1216_v30  ;;  %1303 = vmatpush.msrb.mxu1 %v2131_v19  ;;  %v1444_v30 = vld [vmem:[%s2437_s0 + $0x8] sm:$0xff] }
 0x210   :  { %1391 = vmatpush.msrb.mxu3 %v2099_v15  ;;  %1279 = vmatpush.msrb.mxu0 %v2254_v51 }
 0x211   :  { %1353 = vmatpush.msrb.mxu2 %v1222_v59  ;;  %1305 = vmatpush.msrb.mxu1 %v2110_v47 }
 0x212   :  { %1393 = vmatpush.msrb.mxu3 %v2216_v2  ;;  %1282 = vmatpush.msrb.mxu0 %v2281_v39 }
 0x213   :  { %1357 = vmatpush.msrb.mxu2 %v1228_v21  ;;  %1307 = vmatpush.msrb.mxu1 %v2180_v25 }
 0x214   :  { %1395 = vmatpush.msrb.mxu3 %v2245_v35  ;;  %1185 = vmatmul.f32.vlgmr.msra.gmra.mxu2 %v934_v36 }
 0x215   :  { %1121 = vmatmul.f32.vlgmr.msra.gmra.mxu0 %v2265_v32  ;;  %1309 = vmatpush.msrb.mxu1 %v2189_v17 }
 0x216   :  { %1285 = vmatpush.msrb.mxu0 %v2300_v4  ;;  %1361 = vmatpush.msrb.mxu2 %v1234_v40 }
 0x217   :  { %1397 = vmatpush.msrb.mxu3 %v2267_v50  ;;  %1151 = vmatmul.f32.vlgmr.msra.gmra.mxu1 %v2265_v32 }
 0x218   :  { %1251 = vmatmul.f32.vlgmr.msra.gmra.mxu3 %v2265_v32  ;;  %1288 = vmatpush.msrb.mxu0 %v2314_v10 }
 0x219   :  { %1311 = vmatpush.msrb.mxu1 %v2099_v15  ;;  %1365 = vmatpush.msrb.mxu2 %v1240_v53 }
 0x21a   :  { %1399 = vmatpush.msrb.mxu3 %v2283_v49  ;;  %899 = vperm.xlu0 %1442, %v896_v61  }
 0x21b   :  { %1313 = vmatpush.msrb.mxu1 %v2216_v2  ;;  %1369 = vmatpush.msrb.mxu2 %v1246_v33 }
 0x21c   :  { %1371 = vmatmul.f32.vlgmr.msrb.gmra.mxu2 %v2265_v32 }
 0x21d   :  { %1315 = vmatpush.msrb.mxu1 %v2245_v35  ;;  %1291 = vmatmul.f32.vlgmr.msrb.gmra.mxu0 %v2308_v14 }
 0x21f   :  { %1317 = vmatpush.msrb.mxu1 %v2267_v50 }
 0x220   :  { %1401 = vmatmul.f32.vlgmr.msrb.gmra.mxu3 %v2265_v32 }
 0x221   :  { %1319 = vmatpush.msrb.mxu1 %v2283_v49 }
 0x222   :  { %1323 = vmatmul.f32.vlgmr.msrb.gmra.mxu1 %v2331_v11 }
 0x281   :  { %v936_v15 = vpop.f32.mrf.mxu0 }
 0x288   :  { %v1074_v1 = vpop.f32.mrf.mxu3 }
 0x28b   :  { %v1002_v45 = vpop.f32.mrf.mxu1  ;;  %v1042_v19 = vpop.f32.mrf.mxu2 }
 0x28c   :  { %v900_v47 = vpop.permute.xlu0 %899 }
 0x28d   :  { %v937_v13 = vadd.f32 %v936_v15, %v900_v47 }
 0x28f   :  { %v1003_v60 = vadd.f32 %v1002_v45, %v937_v13 }
 0x291   :  { %v1043_v31 = vadd.f32 %v1042_v19, %v1003_v60 }
 0x292   :  { %v1122_v37 = vpop.f32.mrf.mxu0 }
 0x293   :  { %v1075_v25 = vadd.f32 %v1074_v1, %v1043_v31 }
 0x294   :  { %v1152_v28 = vpop.f32.mrf.mxu1 }
 0x295   :  { %v1123_v17 = vadd.f32 %v1122_v37, %v1075_v25 }
 0x297   :  { %v1153_v44 = vadd.f32 %v1152_v28, %v1123_v17  ;;  %v1186_v41 = vpop.f32.mrf.mxu2 }
 0x298   :  { %v1187_v3 = vadd.f32 %v1186_v41, %v900_v47 }
 0x299   :  { %v1405_v2 = vadd.f32 %v1443_v8, %v1153_v44 }
 0x29a   :  { %v1292_v56 = vpop.f32.mrf.mxu0 }
 0x29b   :  { %v1252_v6 = vpop.f32.mrf.mxu3  ;;  %1407 = vst [vmem:[#allocation9] sm:$0xff] %v1405_v2 }
 0x29c   :  { %v1253_v54 = vadd.f32 %v1252_v6, %v1187_v3 }
 0x29e   :  { %v1293_v29 = vadd.f32 %v1292_v56, %v1253_v54 }
 0x29f   :  { %v1324_v55 = vpop.f32.mrf.mxu1  ;;  %v1372_v63 = vpop.f32.mrf.mxu2 }
 0x2a0   :  { %v1325_v35 = vadd.f32 %v1324_v55, %v1293_v29 }
 0x2a2   :  { %v1373_v38 = vadd.f32 %v1372_v63, %v1325_v35 }
 0x2a3   :  { %v1402_v51 = vpop.f32.mrf.mxu3 }
 0x2a4   :  { %v1403_v20 = vadd.f32 %v1402_v51, %v1373_v38 }
 0x2a6   :  { %v1406_v32 = vadd.f32 %v1444_v30, %v1403_v20 }
 0x2a8   :  { %1408 = vst [vmem:[#allocation9 + $0x8] sm:$0xff] %v1406_v32 }
 0x2a9   :  { %1419 = dma.vmem_to_hbm [thread:$0]  %s1415_s27, 256, %s1417_s30, [#allocation5]  }
 0x2aa   :  { %1545 = dma.done.wait [#allocation5], 256  }
 0x2ab   :  { %1546 = vsyncadd [#allocation5], 4294967040 }
 0x2ac   :  { %1424 = vsyncpa [#allocation4], 1 }
 0x2ad   :  { %1425 = vsyncpa [#allocation7], 1 }
 0x2ae   :  { %1426 = vsyncpa [#allocation5], 1 }

</bundles_post_ra>
